<compile_context>
chip_gen: v7x
topology: tpu7x:2x2x1
jax: 0.10.0
libtpu: 0.0.40
codegen_flags: <defaults>
</compile_context>

<pallas_src>
import functools

import jax
import jax.numpy as jnp
from jax.experimental import pallas as pl
from jax.experimental.pallas import tpu as pltpu


_LANE = 128
_MAX_TILE_M = 1024   # diminishing HBM-roofline returns past ~512-1024 rows
_K_TILE = 2048       # tile the contraction only for very deep patches


def _round_up(v, m):
    return ((v + m - 1) // m) * m


def _sublane(dtype):
    # Sublane packing multiple: 8 for 32-bit, 16 for 16-bit, 32 for 8-bit.
    return max(8, 32 // jnp.dtype(dtype).itemsize)


def _vmem_capacity_bytes():
    try:
        cap = getattr(pltpu.get_tpu_info(), "vmem_capacity_bytes", None)
        if cap:
            return int(cap)
    except Exception:
        pass
    return 64 * 1024 * 1024   # conservative fallback: v7x per-TensorCore VMEM


def _choose_tiles(M, K, E_pad, in_itemsize, out_itemsize, sublane, budget):
    """Pick (tile_m, tile_k, tile_e) and grid sizes within a VMEM budget."""
    # --- K (contraction) tiling: only for very deep patches ---------------
    if K > _K_TILE:
        tile_k = _round_up(pl.cdiv(K, pl.cdiv(K, _K_TILE)), _LANE)
        grid_k = pl.cdiv(K, tile_k)
    else:
        tile_k, grid_k = K, 1
    k_lane = _round_up(tile_k, _LANE)      # lane-padded x-tile depth
    k_sub = _round_up(tile_k, sublane)     # sublane-padded weight-tile depth

    # --- E tiling: only when the double-buffered weight would hog VMEM ----
    tile_e, grid_e = E_pad, 1
    while 2 * k_sub * tile_e * in_itemsize > budget // 2 and tile_e > _LANE:
        grid_e *= 2
        tile_e = _round_up(pl.cdiv(E_pad, grid_e), _LANE)
    grid_e = pl.cdiv(E_pad, tile_e)

    # --- Solve the largest TILE_M that fits the remaining budget ----------
    k_tiled = grid_k > 1
    fixed = (2 * k_sub * tile_e * in_itemsize   # weight (double-buffered)
             + 2 * 8 * tile_e * 4)              # bias (sublane-padded, f32)
    per_row = (2 * k_lane * in_itemsize         # x tile (double-buffered)
               + 2 * tile_e * out_itemsize      # out tile (double-buffered)
               + (4 * tile_e if k_tiled else 0))  # f32 accumulator scratch
    avail = max(budget - fixed, per_row * sublane)
    tile_m_max = max(sublane,
                     min(_MAX_TILE_M, (avail // per_row) // sublane * sublane))

    # Re-balance so tiles divide M nearly evenly (avoid ~2x padding waste
    # when M is just over a tile) and so grid_m >= 2, which lets the
    # "parallel" M axis split across both v7x TensorCores.
    n_m = pl.cdiv(M, tile_m_max)
    if M > sublane:
        n_m = max(n_m, 2)
    tile_m = _round_up(pl.cdiv(M, n_m), sublane)
    grid_m = pl.cdiv(M, tile_m)

    ws_bytes = (2 * tile_m * k_lane * in_itemsize
                + 2 * k_sub * tile_e * in_itemsize
                + 2 * 8 * tile_e * 4
                + 2 * tile_m * tile_e * out_itemsize
                + (tile_m * tile_e * 4 if k_tiled else 0))
    return tile_m, tile_k, tile_e, grid_m, grid_k, grid_e, ws_bytes


def _patch_embed_kernel(x_ref, w_ref, b_ref, o_ref):
    # x: (TILE_M, K), w: (K, TILE_E), b: (1, TILE_E) f32, o: (TILE_M, TILE_E)
    acc = jnp.dot(x_ref[...], w_ref[...], preferred_element_type=jnp.float32)
    o_ref[...] = (acc + b_ref[...]).astype(o_ref.dtype)


def _patch_embed_kernel_ktiled(x_ref, w_ref, b_ref, o_ref, acc_ref):
    # Grid = (grid_e, grid_m, grid_k); K is the innermost ("arbitrary") axis.
    k = pl.program_id(2)

    @pl.when(k == 0)
    def _():
        acc_ref[...] = jnp.zeros_like(acc_ref)

    acc_ref[...] += jnp.dot(x_ref[...], w_ref[...],
                            preferred_element_type=jnp.float32)

    @pl.when(k == pl.num_programs(2) - 1)
    def _():
        o_ref[...] = (acc_ref[...] + b_ref[...]).astype(o_ref.dtype)


@functools.partial(jax.jit, static_argnums=(3, 4))
def patch_embed_1d(x, weight, bias, patch_size, cast_inputs_to_bf16=False):
    """Pallas implementation of PatchEmbed1D.forward (norm_layer=None).

    Args:
      x:       (B, T, C)  input sequence (C == in_chans).
      weight:  (E, C, p)  Conv1d weight (out_channels, in_channels, kernel).
      bias:    (E,)       Conv1d bias.
      patch_size: int p (stride == kernel size).
      cast_inputs_to_bf16: optional bandwidth optimization (changes numerics
        slightly for f32 inputs; accumulation stays f32).

    Returns:
      (B, ceil(T/p), E) in x.dtype.
    """
    B, T, C = x.shape
    E = weight.shape[0]
    p = int(patch_size)

    out_dtype = x.dtype
    compute_dtype = jnp.bfloat16 if cast_inputs_to_bf16 else x.dtype

    # Right-pad T to a multiple of p (matches F.pad(x, (0, pad)) in PyTorch).
    pad_t = (-T) % p
    if pad_t:
        x = jnp.pad(x, ((0, 0), (0, pad_t), (0, 0)))
    Tp = (T + pad_t) // p

    # (B, Tp, p, C) -> (B*Tp, p*C); flattened patch order is (k, c).
    x_flat = x.reshape(B, Tp, p, C).reshape(B * Tp, p * C).astype(compute_dtype)
    M, K = x_flat.shape

    # W[e, c, k] -> W_flat[k*C + c, e], matching the (k, c) patch flattening.
    w_flat = jnp.transpose(weight, (2, 1, 0)).reshape(K, E).astype(compute_dtype)

    # Lane-dense output stores: pad E to a multiple of 128.
    E_pad = _round_up(E, _LANE)

    in_itemsize = jnp.dtype(compute_dtype).itemsize
    out_itemsize = jnp.dtype(out_dtype).itemsize
    sublane = max(_sublane(compute_dtype), _sublane(out_dtype))

    vmem_cap = _vmem_capacity_bytes()
    budget = (vmem_cap * 45) // 100   # ~57 MiB on v5e/v6e, ~28 MiB on v7x

    tile_m, tile_k, tile_e, grid_m, grid_k, grid_e, ws_bytes = _choose_tiles(
        M, K, E_pad, in_itemsize, out_itemsize, sublane, budget)

    M_grid = grid_m * tile_m
    K_grid = grid_k * tile_k
    E_grid = grid_e * tile_e

    # Zero-pad operands to the gridded extents (never changes the result:
    # padded rows are sliced off, padded K columns contribute nothing).
    x_flat = jnp.pad(x_flat, ((0, M_grid - M), (0, K_grid - K)))
    w_flat = jnp.pad(w_flat, ((0, K_grid - K), (0, E_grid - E)))
    bias2d = jnp.pad(bias.astype(jnp.float32), (0, E_grid - E)).reshape(1, E_grid)

    w_reads = grid_m if grid_k > 1 else 1
    cost = pl.CostEstimate(
        flops=2 * M_grid * K_grid * E_grid,
        bytes_accessed=(in_itemsize * (grid_e * M_grid * K_grid
                                       + w_reads * K_grid * E_grid)
                        + out_itemsize * M_grid * E_grid + 4 * E_grid),
        transcendentals=0,
    )
    compiler_params = pltpu.CompilerParams(
        dimension_semantics=(("parallel", "parallel", "arbitrary")
                             if grid_k > 1 else ("parallel", "parallel")),
        # Raise the scoped VMEM limit explicitly so the generation-aware tile
        # budget is actually usable (default scoped is only 16/32 MiB).
        vmem_limit_bytes=int(min(vmem_cap, max(ws_bytes + (4 << 20), 32 << 20))),
    )

    if grid_k > 1:
        # Deep contraction: K grid axis with an f32 VMEM accumulator.
        # TODO(synk): weight block is still double-buffered by the pipeline;
        # force single buffering via pipeline_mode once universally supported.
        out_flat = pl.pallas_call(
            _patch_embed_kernel_ktiled,
            out_shape=jax.ShapeDtypeStruct((M_grid, E_grid), out_dtype),
            grid=(grid_e, grid_m, grid_k),
            in_specs=[
                pl.BlockSpec((tile_m, tile_k), lambda j, i, k: (i, k)),
                pl.BlockSpec((tile_k, tile_e), lambda j, i, k: (k, j)),
                pl.BlockSpec((1, tile_e), lambda j, i, k: (0, j)),
            ],
            out_specs=pl.BlockSpec((tile_m, tile_e), lambda j, i, k: (i, j)),
            scratch_shapes=[pltpu.VMEM((tile_m, tile_e), jnp.float32)],
            compiler_params=compiler_params,
            cost_estimate=cost,
        )(x_flat, w_flat, bias2d)
    else:
        # Common case: weight/bias resident (constant block index across the
        # inner M loop), streamed M slabs double-buffered by the pipeline.
        out_flat = pl.pallas_call(
            _patch_embed_kernel,
            out_shape=jax.ShapeDtypeStruct((M_grid, E_grid), out_dtype),
            grid=(grid_e, grid_m),
            in_specs=[
                pl.BlockSpec((tile_m, tile_k), lambda j, i: (i, 0)),
                pl.BlockSpec((tile_k, tile_e), lambda j, i: (0, j)),
                pl.BlockSpec((1, tile_e), lambda j, i: (0, j)),
            ],
            out_specs=pl.BlockSpec((tile_m, tile_e), lambda j, i: (i, j)),
            compiler_params=compiler_params,
            cost_estimate=cost,
        )(x_flat, w_flat, bias2d)

    return out_flat[:M, :E].reshape(B, Tp, E)


def patch_embed_1d_ref(x, weight, bias, patch_size):
    """Pure-JAX reference (mirrors the PyTorch Conv1d semantics)."""
    B, T, C = x.shape
    p = patch_size
    pad = (-T) % p
    if pad:
        x = jnp.pad(x, ((0, 0), (0, pad), (0, 0)))
    Tp = (T + pad) // p
    xp = x.reshape(B, Tp, p, C)  # x[b, t', k, c]
    out = jnp.einsum("btkc,eck->bte", xp, weight) + bias[None, None, :]
    return out


if __name__ == "__main__":
    # Small shapes consistent with the module:
    # batch=2, seq T=16, in_chans=4, patch_size=4, embed_dim=32.
    B, T, C = 2, 16, 4
    P = 4
    E = 32

    key = jax.random.PRNGKey(0)
    kx, kw, kb = jax.random.split(key, 3)

    x = jax.random.normal(kx, (B, T, C), dtype=jnp.float32)
    weight = jax.random.normal(kw, (E, C, P), dtype=jnp.float32) * 0.1
    bias = jax.random.normal(kb, (E,), dtype=jnp.float32) * 0.1

    out = jax.block_until_ready(patch_embed_1d(x, weight, bias, P))
    ref = patch_embed_1d_ref(x, weight, bias, P)
    assert out.shape == (B, T // P, E), out.shape
    assert jnp.allclose(out, ref, atol=1e-5, rtol=1e-5), float(
        jnp.max(jnp.abs(out - ref)))

    # T not divisible by patch_size exercises the right-pad path.
    T2 = 18
    x2 = jax.random.normal(kx, (B, T2, C), dtype=jnp.float32)
    out2 = jax.block_until_ready(patch_embed_1d(x2, weight, bias, P))
    ref2 = patch_embed_1d_ref(x2, weight, bias, P)
    assert out2.shape == (B, (T2 + P - 1) // P, E), out2.shape
    assert jnp.allclose(out2, ref2, atol=1e-5, rtol=1e-5), float(
        jnp.max(jnp.abs(out2 - ref2)))

    print("KERNEL_OK")
</pallas_src>

<mosaic_0001>
module attributes {stable_mosaic.version = 11 : i64} {
  func.func @_patch_embed_kernel(%arg0: i32, %arg1: i32, %arg2: memref<8x16xf32, #tpu.memory_space<vmem>>, %arg3: memref<16x128xf32, #tpu.memory_space<vmem>>, %arg4: memref<1x128xf32, #tpu.memory_space<vmem>>, %arg5: memref<8x128xf32, #tpu.memory_space<vmem>>) attributes {dimension_semantics = [#tpu.dimension_semantics<parallel>, #tpu.dimension_semantics<parallel>], iteration_bounds = array<i64: 1, 1>, scalar_prefetch = 0 : i64, scratch_operands = 0 : i64, tpu.core_type = #tpu.core_type<tc>, window_params = [{transform_indices = @transform_0, window_bounds = array<i64: 8, 16>}, {transform_indices = @transform_1, window_bounds = array<i64: 16, 128>}, {transform_indices = @transform_2, window_bounds = array<i64: 1, 128>}, {transform_indices = @transform_3, window_bounds = array<i64: 8, 128>}]} {
    %c0 = arith.constant 0 : index
    %c0_0 = arith.constant 0 : index
    %0 = vector.load %arg2[%c0, %c0_0] : memref<8x16xf32, #tpu.memory_space<vmem>>, vector<8x16xf32>
    %c0_1 = arith.constant 0 : index
    %c0_2 = arith.constant 0 : index
    %1 = vector.load %arg3[%c0_1, %c0_2] : memref<16x128xf32, #tpu.memory_space<vmem>>, vector<16x128xf32>
    %cst = arith.constant dense<0.000000e+00> : vector<8x128xf32>
    %2 = tpu.matmul %0, %1, %cst {dimension_numbers = #tpu.dot_dimension_numbers<[1], [0], [0], [1], [0, 0, 1, 1], [], []>} : vector<8x16xf32>, vector<16x128xf32>, vector<8x128xf32> -> vector<8x128xf32>
    %c0_3 = arith.constant 0 : index
    %c0_4 = arith.constant 0 : index
    %3 = vector.load %arg4[%c0_3, %c0_4] : memref<1x128xf32, #tpu.memory_space<vmem>>, vector<1x128xf32>
    %4 = vector.broadcast %3 : vector<1x128xf32> to vector<8x128xf32>
    %5 = arith.addf %2, %4 : vector<8x128xf32>
    %c0_5 = arith.constant 0 : index
    %c0_6 = arith.constant 0 : index
    %6 = vector.load %arg5[%c0_5, %c0_6] : memref<8x128xf32, #tpu.memory_space<vmem>>, vector<8x128xf32>
    tpu.vector_store %arg5[%c0_5, %c0_6], %5 {strides = array<i32>} : memref<8x128xf32, #tpu.memory_space<vmem>>, vector<8x128xf32>,
    return
  }
  func.func @transform_0(%arg0: i32, %arg1: i32) -> (i32, i32) {
    %c0_i32 = arith.constant 0 : i32
    %c0_i32_0 = arith.constant 0 : i32
    return %arg1, %c0_i32 : i32, i32
  }
  func.func @transform_1(%arg0: i32, %arg1: i32) -> (i32, i32) {
    %c0_i32 = arith.constant 0 : i32
    %c0_i32_0 = arith.constant 0 : i32
    return %c0_i32, %arg0 : i32, i32
  }
  func.func @transform_2(%arg0: i32, %arg1: i32) -> (i32, i32) {
    %c0_i32 = arith.constant 0 : i32
    %c0_i32_0 = arith.constant 0 : i32
    return %c0_i32, %arg0 : i32, i32
  }
  func.func @transform_3(%arg0: i32, %arg1: i32) -> (i32, i32) {
    %c0_i32 = arith.constant 0 : i32
    return %arg1, %arg0 : i32, i32
  }
}

</mosaic_0001>

<bundles_post_ra>
// kernel: patch_embed_1d.1
= control target key start
LH: loop header
LB: loop body
LE: loop exit
PB: predicated region body
PF: predicated region fallthrough
CT: control target
= control target key end

     0   :  { %v157_v2 = vmov 0.0|0.0   ;;  %vm158_vm0 = vmmov 0   ;;  %v159_v4 = vmov 0.0   ;;  %s205_s0 = inlined_call_operand.vmem [shape: f32[8,16], index: 0, kind: input, shape index: {}]   ;;  %s206_s1 = inlined_call_operand.vmem [shape: f32[16,128], index: 1, kind: input, shape index: {}]   ;;  %s207_s2 = inlined_call_operand.vmem [shape: f32[1,128], index: 2, kind: input, shape index: {}]   ;;  %s208_s3 = inlined_call_operand.hbm [shape: f32[8,128], index: 3, kind: output, shape index: {}]  }
   0x1   :  { %v16_v0 = vld [vmem:[%s206_s1] sm:$0xff]  ;;  %v17_v1 = vld [vmem:[%s206_s1 + $0x8] sm:$0xff]  ;;  %126 = vmatprep.subr.bf16.mxu0 %v157_v2  ;;  %123 = vmatprep.mubr.msk.f32.mxu0 %vm158_vm0, %v159_v4 }
   0x2   :  { %v127_v3 = vpack.c.bf16 %v17_v1, %v16_v0 }
   0x3   :  { %8 = vsyncpa [#allocation3], 0  ;;  %v15_v5 = vld [vmem:[%s205_s0] sm:$0xff]  ;;  %vm25_vm1 = vcmask 130048   ;;  %s160_s20 = smov [#allocation2]  }
   0x4   :  { %128 = vmatpush3.bf16.msra.mxu0 %v127_v3  ;;  %v114_v6 = vld [vmem:[%s207_s2] ss:$0 sm:$0xff]  ;;  %s106_s1 = sshll.u32 %s160_s20, 4  ;;  %s107_s1 = int_to_ptr.vmem [resolvable:$true] %s106_s1 }
   0x5   :  { %s133_s21 = scalar_lea.vmem %s107_s1, 128  ;;  %p138_p1 = scmp.lt.s32.totalorder %s107_s1, %s107_s1 }
   0x6   :  { %p134_p0 = scmp.ne.s32.totalorder %s107_s1, %s133_s21  ;;  %p139_p2 = scmp.lt.s32.totalorder %s133_s21, %s133_s21 }
   0x7   :  { %124 = vmatmul.mubr.msk.f32.vlgmr.msra.gmra.mrb[0].mxu0 %vm25_vm1, %v15_v5 }
   0x8   :  { %p140_p3 = por %p139_p2, %p138_p1 }
   0xa   :  { %p141_p4 = pnand %p140_p3, %p134_p0 }
  0xda   :  { %v95_v7 = vpop.f32.mrb[0].mxu0 }
  0xdb   :  { %v96_v8 = vadd.f32 %v114_v6, %v95_v7  ;;  %v125_v9 = vpop.f32.mrb[1].mxu0 }
  0xdd   :  { %99 = vst [vmem:[#allocation2] sm:$0xff] %v96_v8 }
  0xde   :  { %144 = shalt.err (!%p141_p4)
}
  0xdf   :  { %s145_s23 = scalar_lea.hbm %s208_s3, 128 }
  0xe0   :  { %p146_p5 = scmp.ne.s32.totalorder %s208_s3, %s145_s23  ;;  %p149_p6 = scmp.lt.u32.totalorder %s145_s23, %s208_s3 }
  0xe2   :  { %p151_p7 = pnand %p149_p6, %p146_p5 }
  0xe4   :  { %154 = shalt.err (!%p151_p7)
}
  0xe5   :  { %109 = dma.vmem_to_hbm [thread:$0]  %s107_s1, 128, %s208_s3, [#allocation3]  }
  0xe6   :  { %155 = dma.done.wait [#allocation3], 128  }
  0xe7   :  { %156 = vsyncadd [#allocation3], 4294967168 }
  0xe8   :  { %113 = vsyncpa [#allocation3], 1 }

</bundles_post_ra>
